<compile_context>
chip_gen: v7x
topology: tpu7x:2x2x1
jax: 0.10.0
libtpu: 0.0.40
codegen_flags: <defaults>
</compile_context>

<pallas_src>
import functools

import jax
import jax.numpy as jnp
from jax.experimental import pallas as pl
from jax.experimental.pallas import tpu as pltpu


_VMEM_WS_BUDGET = 40 * 1024 * 1024   # double-buffered working-set budget
_VMEM_LIMIT = 48 * 1024 * 1024       # scoped VMEM limit (v7x physical = 64 MiB)


def _round_up(x: int, m: int) -> int:
    return ((x + m - 1) // m) * m


def _largest_divisor_tile(total: int, align: int, cap: int) -> int:
    """Largest multiple of `align` that divides `total` and is <= cap.

    Assumes total % align == 0, so `align` itself is always valid."""
    best = align
    t = align
    limit = min(total, max(align, cap))
    while t <= limit:
        if total % t == 0:
            best = t
        t += align
    return best


def _working_set_bytes(tm: int, tn: int, tk: int, x_bytes: int) -> int:
    # Double-buffered x / W / bias input tiles + double-buffered output tile.
    return 2 * (tm * tk * x_bytes + tk * tn * 2 + tn * 4 + tm * tn * 4)


def _linear_bias_kernel(x_ref, w_ref, b_ref, o_ref):
    # Full-K variant: whole reduction in one MXU pass, bias fused.
    # x is cast to bf16 in-kernel; accumulate / add bias in f32 (v5e-safe).
    x = x_ref[...].astype(jnp.bfloat16)
    o_ref[...] = (
        jnp.dot(x, w_ref[...], preferred_element_type=jnp.float32) + b_ref[...]
    )


def _linear_bias_kred_kernel(x_ref, w_ref, b_ref, o_ref):
    # K-tiled variant: accumulate directly into the resident f32 output block
    # (its index_map ignores k); bias folded into the k == 0 initialization.
    k = pl.program_id(2)
    x = x_ref[...].astype(jnp.bfloat16)
    partial = jnp.dot(x, w_ref[...], preferred_element_type=jnp.float32)

    @pl.when(k == 0)
    def _():
        o_ref[...] = b_ref[...] + partial

    @pl.when(k > 0)
    def _():
        o_ref[...] += partial


def prepare_params(weight, bias):
    """One-time layout plumbing: W (O, H) -> (Hp, Op) bf16, bias -> (1, Op) f32."""
    O, H = weight.shape
    Hp = _round_up(H, 128)
    Op = _round_up(O, 128)
    w_p = (
        jnp.zeros((Hp, Op), jnp.bfloat16)
        .at[:H, :O]
        .set(weight.T.astype(jnp.bfloat16))
    )
    b_p = jnp.zeros((1, Op), jnp.float32).at[0, :O].set(bias.astype(jnp.float32))
    return w_p, b_p


@functools.partial(jax.jit, static_argnames=("out_dim",))
def classifier_forward_prepared(x, w_p, b_p, *, out_dim):
    """y = x @ W.T + b with pre-prepared (Hp, Op) bf16 weight and (1, Op) f32 bias."""
    B, H = x.shape
    Hp, Op = w_p.shape
    assert _round_up(H, 128) == Hp, f"hidden dim mismatch: {H} vs {Hp}"

    # --- x: skip the extra HBM pass entirely when already TPU-aligned -------
    if B % 8 == 0 and H == Hp:
        x_in = x                       # original dtype; cast in-kernel
        Mp = B
    else:
        Mp = _round_up(B, 8)
        # Padding is unavoidable here -> fold the bf16 cast into the same pass.
        x_in = (
            jnp.zeros((Mp, Hp), jnp.bfloat16)
            .at[:B, :H]
            .set(x.astype(jnp.bfloat16))
        )
    x_bytes = x_in.dtype.itemsize

    # --- tile selection: exact divisors of the padded shapes ---------------
    tn = _largest_divisor_tile(Op, 128, 512)
    cap_m = 512
    if Mp >= 128:
        # Keep >= 2 M tiles so v7x's second TensorCore is not idle.
        cap_m = min(cap_m, Mp // 2)
    tm = _largest_divisor_tile(Mp, 8, cap_m)

    if _working_set_bytes(tm, tn, Hp, x_bytes) <= _VMEM_WS_BUDGET:
        tk = Hp                        # full reduction per tile -> no K axis
    else:
        tk = 128
        t = 128
        while t <= min(Hp, 2048):
            if Hp % t == 0 and _working_set_bytes(tm, tn, t, x_bytes) <= _VMEM_WS_BUDGET:
                tk = t
            t += 128

    grid_m = Mp // tm
    grid_n = Op // tn

    cost = pl.CostEstimate(
        flops=2 * Mp * Hp * Op,
        transcendentals=0,
        bytes_accessed=(
            Mp * Hp * x_bytes * grid_n      # x re-read once per N tile
            + Hp * Op * 2 * grid_m          # W re-read once per M tile
            + Op * 4 * grid_m               # bias
            + Mp * Op * 4                   # output (f32)
        ),
    )

    if tk == Hp:
        grid = (grid_m, grid_n)
        kernel = _linear_bias_kernel
        in_specs = [
            pl.BlockSpec((tm, Hp), lambda i, j: (i, 0)),   # x tile
            pl.BlockSpec((Hp, tn), lambda i, j: (0, j)),   # W^T tile
            pl.BlockSpec((1, tn), lambda i, j: (0, j)),    # bias tile
        ]
        out_spec = pl.BlockSpec((tm, tn), lambda i, j: (i, j))
        dims = ("parallel", "parallel")
    else:
        grid = (grid_m, grid_n, Hp // tk)
        kernel = _linear_bias_kred_kernel
        in_specs = [
            pl.BlockSpec((tm, tk), lambda i, j, k: (i, k)),
            pl.BlockSpec((tk, tn), lambda i, j, k: (k, j)),
            pl.BlockSpec((1, tn), lambda i, j, k: (0, j)),
        ]
        out_spec = pl.BlockSpec((tm, tn), lambda i, j, k: (i, j))
        dims = ("parallel", "parallel", "arbitrary")

    out_padded = pl.pallas_call(
        kernel,
        out_shape=jax.ShapeDtypeStruct((Mp, Op), jnp.float32),
        grid=grid,
        in_specs=in_specs,
        out_specs=out_spec,
        compiler_params=pltpu.CompilerParams(
            dimension_semantics=dims,
            vmem_limit_bytes=_VMEM_LIMIT,
        ),
        cost_estimate=cost,
    )(x_in, w_p, b_p)

    return out_padded[:B, :out_dim]


def classifier_forward(x, weight, bias):
    """Convenience one-shot wrapper (prep not hoisted; prefer prepare_params)."""
    w_p, b_p = prepare_params(weight, bias)
    return classifier_forward_prepared(x, w_p, b_p, out_dim=weight.shape[0])


def init_params(key, hidden_dims, output_dim=10):
    """Deterministic init mirroring nn.Linear default (uniform +/- 1/sqrt(fan_in))."""
    kw, kb = jax.random.split(key)
    bound = 1.0 / jnp.sqrt(hidden_dims)
    weight = jax.random.uniform(
        kw, (output_dim, hidden_dims), jnp.float32, -bound, bound
    )
    bias = jax.random.uniform(kb, (output_dim,), jnp.float32, -bound, bound)
    return weight, bias


def _ref_linear_bf16(x, weight, bias):
    """f32 reference with the kernel's bf16 operand rounding, exact accumulation."""
    xb = x.astype(jnp.bfloat16).astype(jnp.float32)
    wb = weight.astype(jnp.bfloat16).astype(jnp.float32)
    return jnp.dot(xb, wb.T, precision=jax.lax.Precision.HIGHEST) + bias


if __name__ == "__main__":
    key = jax.random.PRNGKey(0)
    k_x, k_p = jax.random.split(key)

    batch = 2
    hidden_dims = 32
    output_dim = 10

    x = jax.random.normal(k_x, (batch, hidden_dims), dtype=jnp.float32)
    weight, bias = init_params(k_p, hidden_dims, output_dim)

    # Hoisted one-time weight layout prep, then the jitted Pallas forward.
    w_p, b_p = prepare_params(weight, bias)
    y = classifier_forward_prepared(x, w_p, b_p, out_dim=output_dim)
    jax.block_until_ready(y)
    assert y.shape == (batch, output_dim)

    ref_bf16 = _ref_linear_bf16(x, weight, bias)
    ref_f32 = x @ weight.T + bias
    assert jnp.allclose(y, ref_bf16, atol=1e-3, rtol=1e-3), (
        jnp.max(jnp.abs(y - ref_bf16))
    )
    assert jnp.allclose(y, ref_f32, atol=5e-2, rtol=5e-2), (
        jnp.max(jnp.abs(y - ref_f32))
    )

    # Aligned shape: exercises the zero-copy x path (no wrapper pad/cast) and
    # a multi-tile M grid (2 "parallel" M tiles).
    x2 = jax.random.normal(jax.random.PRNGKey(1), (256, 128), dtype=jnp.float32)
    w2, b2 = init_params(jax.random.PRNGKey(2), 128, output_dim)
    w2_p, b2_p = prepare_params(w2, b2)
    y2 = classifier_forward_prepared(x2, w2_p, b2_p, out_dim=output_dim)
    jax.block_until_ready(y2)
    assert y2.shape == (256, output_dim)
    ref2 = _ref_linear_bf16(x2, w2, b2)
    assert jnp.allclose(y2, ref2, atol=2e-3, rtol=2e-3), (
        jnp.max(jnp.abs(y2 - ref2))
    )

    print("KERNEL_OK")
</pallas_src>

<mosaic_0001>
module attributes {stable_mosaic.version = 11 : i64} {
  func.func @_linear_bias_kernel(%arg0: i32, %arg1: i32, %arg2: memref<8x128xbf16, #tpu.memory_space<vmem>>, %arg3: memref<128x128xbf16, #tpu.memory_space<vmem>>, %arg4: memref<1x128xf32, #tpu.memory_space<vmem>>, %arg5: memref<8x128xf32, #tpu.memory_space<vmem>>) attributes {dimension_semantics = [#tpu.dimension_semantics<parallel>, #tpu.dimension_semantics<parallel>], iteration_bounds = array<i64: 1, 1>, scalar_prefetch = 0 : i64, scratch_operands = 0 : i64, tpu.core_type = #tpu.core_type<tc>, window_params = [{transform_indices = @transform_0, window_bounds = array<i64: 8, 128>}, {transform_indices = @transform_1, window_bounds = array<i64: 128, 128>}, {transform_indices = @transform_2, window_bounds = array<i64: 1, 128>}, {transform_indices = @transform_3, window_bounds = array<i64: 8, 128>}]} {
    %c0 = arith.constant 0 : index
    %c0_0 = arith.constant 0 : index
    %0 = vector.load %arg2[%c0, %c0_0] : memref<8x128xbf16, #tpu.memory_space<vmem>>, vector<8x128xbf16>
    %c0_1 = arith.constant 0 : index
    %c0_2 = arith.constant 0 : index
    %1 = vector.load %arg3[%c0_1, %c0_2] : memref<128x128xbf16, #tpu.memory_space<vmem>>, vector<128x128xbf16>
    %cst = arith.constant dense<0.000000e+00> : vector<8x128xf32>
    %2 = tpu.matmul %0, %1, %cst {dimension_numbers = #tpu.dot_dimension_numbers<[1], [0], [0], [1], [0, 0, 1, 1], [], []>} : vector<8x128xbf16>, vector<128x128xbf16>, vector<8x128xf32> -> vector<8x128xf32>
    %c0_3 = arith.constant 0 : index
    %c0_4 = arith.constant 0 : index
    %3 = vector.load %arg4[%c0_3, %c0_4] : memref<1x128xf32, #tpu.memory_space<vmem>>, vector<1x128xf32>
    %4 = vector.broadcast %3 : vector<1x128xf32> to vector<8x128xf32>
    %5 = arith.addf %2, %4 : vector<8x128xf32>
    %c0_5 = arith.constant 0 : index
    %c0_6 = arith.constant 0 : index
    %6 = vector.load %arg5[%c0_5, %c0_6] : memref<8x128xf32, #tpu.memory_space<vmem>>, vector<8x128xf32>
    tpu.vector_store %arg5[%c0_5, %c0_6], %5 {strides = array<i32>} : memref<8x128xf32, #tpu.memory_space<vmem>>, vector<8x128xf32>,
    return
  }
  func.func @transform_0(%arg0: i32, %arg1: i32) -> (i32, i32) {
    %c0_i32 = arith.constant 0 : i32
    %c0_i32_0 = arith.constant 0 : i32
    return %arg0, %c0_i32 : i32, i32
  }
  func.func @transform_1(%arg0: i32, %arg1: i32) -> (i32, i32) {
    %c0_i32 = arith.constant 0 : i32
    %c0_i32_0 = arith.constant 0 : i32
    return %c0_i32, %arg1 : i32, i32
  }
  func.func @transform_2(%arg0: i32, %arg1: i32) -> (i32, i32) {
    %c0_i32 = arith.constant 0 : i32
    %c0_i32_0 = arith.constant 0 : i32
    return %c0_i32, %arg1 : i32, i32
  }
  func.func @transform_3(%arg0: i32, %arg1: i32) -> (i32, i32) {
    %c0_i32 = arith.constant 0 : i32
    return %arg0, %arg1 : i32, i32
  }
}

</mosaic_0001>

<bundles_post_ra>
// kernel: classifier_forward_prepared.1
= control target key start
LH: loop header
LB: loop body
LE: loop exit
PB: predicated region body
PF: predicated region fallthrough
CT: control target
= control target key end

     0   :  { %8 = vsyncpa [#allocation3], 0  ;;  %s222_s12 = smov [#allocation2]   ;;  %s268_s0 = inlined_call_operand.vmem [shape: bf16[8,128], index: 0, kind: input, shape index: {}]   ;;  %s269_s1 = inlined_call_operand.hbm [shape: bf16[128,128], index: 1, kind: input, shape index: {}]   ;;  %s270_s2 = inlined_call_operand.vmem [shape: f32[1,128], index: 2, kind: input, shape index: {}]   ;;  %s271_s3 = inlined_call_operand.vmem [shape: f32[8,128], index: 3, kind: output, shape index: {}]  }
   0x1   :  { %s16_s13 = sshll.u32 %s222_s12, 4  ;;  %s198_s16 = scalar_lea.hbm %s269_s1, 1024  ;;  %s17_s13 = int_to_ptr.vmem [resolvable:$true] %s16_s13 }
   0x2   :  { %p199_p0 = scmp.ne.s32.totalorder %s269_s1, %s198_s16  ;;  %p202_p1 = scmp.lt.u32.totalorder %s198_s16, %s269_s1 }
   0x4   :  { %p204_p2 = pnand %p202_p1, %p199_p0 }
   0x6   :  { %207 = shalt.err (!%p204_p2)
}
   0x7   :  { %s208_s21 = scalar_lea.vmem %s17_s13, 1024  ;;  %p213_p4 = scmp.lt.s32.totalorder %s17_s13, %s17_s13 }
   0x8   :  { %p209_p3 = scmp.ne.s32.totalorder %s17_s13, %s208_s21  ;;  %p214_p5 = scmp.lt.s32.totalorder %s208_s21, %s208_s21 }
   0xa   :  { %p215_p6 = por %p214_p5, %p213_p4 }
   0xc   :  { %p216_p7 = pnand %p215_p6, %p209_p3 }
   0xe   :  { %219 = shalt.err (!%p216_p7)
}
   0xf   :  { %s223_s22 = smov 64   ;;  %s224_s23 = smov 4  }
  0x10   :  { %22 = dma.hbm_to_vmem [thread:$0]  %s269_s1, 1024, %s17_s13, [#allocation3], %s223_s22, %s223_s22, %s224_s23  }
  0x11   :  { %220 = dma.done.wait [#allocation3], 1024  }
  0x12   :  { %221 = vsyncadd [#allocation3], 4294966272  ;;  %v225_v0 = vmov 0.0   ;;  %vm226_vm0 = vmmov 0   ;;  %v190_v1 = vld [vmem:[#allocation2] sm:$0xff]   ;;  %v191_v2 = vld [vmem:[#allocation2 + $0x8] sm:$0xff]  }
  0x13   :  { %165 = vmatprep.subr.bf16.mxu0 %v225_v0  ;;  %181 = vmatprep.mubr.msk.bf16.mxu0 %vm226_vm0, %v225_v0  ;;  %v192_v3 = vld [vmem:[#allocation2 + $0x10] sm:$0xff]   ;;  %v193_v4 = vld [vmem:[#allocation2 + $0x18] sm:$0xff]   ;;  %v194_v5 = vld [vmem:[#allocation2 + $0x20] sm:$0xff]  }
  0x14   :  { %166 = vmatpush3.bf16.msra.mxu0 %v190_v1  ;;  %v195_v6 = vld [vmem:[#allocation2 + $0x28] sm:$0xff]   ;;  %v196_v7 = vld [vmem:[#allocation2 + $0x30] sm:$0xff]   ;;  %v197_v8 = vld [vmem:[#allocation2 + $0x38] sm:$0xff]  }
  0x15   :  { %167 = vmatprep.subr.bf16.mxu0 %v225_v0  ;;  %v29_v9 = vld [vmem:[%s268_s0] sm:$0xf] }
  0x16   :  { %v147_v10 = vld [vmem:[%s270_s2] ss:$0 sm:$0xff] }
  0x18   :  { %168 = vmatpush3.bf16.msra.mxu0 %v191_v2 }
  0x19   :  { %169 = vmatprep.subr.bf16.mxu0 %v225_v0 }
  0x1c   :  { %170 = vmatpush3.bf16.msra.mxu0 %v192_v3 }
  0x1d   :  { %171 = vmatprep.subr.bf16.mxu0 %v225_v0 }
  0x20   :  { %172 = vmatpush3.bf16.msra.mxu0 %v193_v4 }
  0x21   :  { %173 = vmatprep.subr.bf16.mxu0 %v225_v0 }
  0x24   :  { %174 = vmatpush3.bf16.msra.mxu0 %v194_v5 }
  0x25   :  { %175 = vmatprep.subr.bf16.mxu0 %v225_v0 }
  0x28   :  { %176 = vmatpush3.bf16.msra.mxu0 %v195_v6 }
  0x29   :  { %177 = vmatprep.subr.bf16.mxu0 %v225_v0 }
  0x2c   :  { %178 = vmatpush3.bf16.msra.mxu0 %v196_v7 }
  0x2d   :  { %179 = vmatprep.subr.bf16.mxu0 %v225_v0 }
  0x30   :  { %180 = vmatpush3.bf16.msra.mxu0 %v197_v8 }
  0x33   :  { %182 = vmatmul.mubr.bf16.vlgmr.msra.gmra.mrb[0].mxu0 %v29_v9 }
 0x106   :  { %v135_v11 = vpop.f32.mrb[0].mxu0 }
 0x107   :  { %v136_v12 = vadd.f32 %v147_v10, %v135_v11  ;;  %v183_v13 = vpop.f32.mrb[1].mxu0 }
 0x108   :  { %v138_v14 = vpop.f32.mrb[2].mxu0 }
 0x109   :  { %141 = vst [vmem:[%s271_s3] sm:$0xff] %v136_v12  ;;  %v184_v15 = vpop.f32.mrb[3].mxu0 }
 0x10a   :  { %146 = vsyncpa [#allocation3], 1 }

</bundles_post_ra>
